<compile_context>
chip_gen: v7x
topology: tpu7x:2x2x1
jax: 0.10.0
libtpu: 0.0.40
codegen_flags: <defaults>
</compile_context>

<pallas_src>
import numpy as np
import jax
import jax.numpy as jnp
from jax.experimental import pallas as pl
from jax.experimental.pallas import tpu as pltpu

# ----------------------------------------------------------------------------
# Static kagome-12 adjacency (sublattice id, 15 neighbour indices per site).
# ----------------------------------------------------------------------------
KAGOME_12_ADJ = [
    (0, [6, 5, 9, 10, 7, 8, 11, 0, 11, 1, 2, 3, 4, 5, 6]),
    (2, [8, 9, 10, 11, 0, 3, 4, 1, 2, 3, 6, 5, 10, 7, 8]),
    (1, [9, 10, 7, 11, 0, 4, 1, 2, 3, 4, 5, 6, 7, 8, 9]),
    (2, [10, 7, 8, 0, 11, 1, 2, 3, 4, 1, 5, 6, 8, 9, 10]),
    (1, [7, 8, 9, 0, 11, 2, 3, 4, 1, 2, 6, 5, 9, 10, 7]),
    (0, [11, 0, 4, 1, 2, 3, 6, 5, 6, 10, 7, 8, 9, 0, 11]),
    (0, [0, 11, 2, 3, 4, 1, 5, 6, 5, 8, 9, 10, 7, 11, 0]),
    (1, [4, 1, 2, 6, 5, 9, 10, 7, 8, 9, 0, 11, 2, 3, 4]),
    (2, [1, 2, 3, 5, 6, 10, 7, 8, 9, 10, 0, 11, 3, 4, 1]),
    (1, [2, 3, 4, 5, 6, 7, 8, 9, 10, 7, 11, 0, 4, 1, 2]),
    (2, [3, 4, 1, 6, 5, 8, 9, 10, 7, 8, 11, 0, 1, 2, 3]),
    (0, [5, 6, 7, 8, 9, 10, 0, 11, 0, 3, 4, 1, 2, 6, 5]),
]

NUMBER_SPINS = 12
SUBLATTICES = 3
KERNEL_SIZE = 15
LANE = 128


def _round_up(x, m):
    return ((x + m - 1) // m) * m


# ----------------------------------------------------------------------------
# Parameter glue: per-sublattice LatticeConvolution weights (S, C_out, C_in, K)
# -> dense (C_in*N, C_out*N) matrix (repeated neighbours summed, matching the
# x[:, :, adj_i] gather semantics), zero-padded to (lane_dim, lane_dim), plus
# an explicit (1, lane_dim) bias vector.
# ----------------------------------------------------------------------------
def _lattice_conv_dense_weight_np(weight, adj, n_spins):
    weight = np.asarray(weight, dtype=np.float32)        # (S, C_out, C_in, K)
    _, c_out, c_in, ksize = weight.shape
    full = np.zeros((c_in * n_spins, c_out * n_spins), dtype=np.float32)
    for i, (s, neigh) in enumerate(adj):
        scatter = np.zeros((ksize, n_spins), dtype=np.float32)
        for k, j in enumerate(neigh):
            scatter[k, j] += 1.0
        # (C_out, C_in, N): contribution of x[b, c, j] to y[b, o, i]
        w_site = np.einsum("ock,kj->ocj", weight[s], scatter)
        for o in range(c_out):
            full[:, o * n_spins + i] = w_site[o].reshape(-1)   # c*N + j ordering
    return full


def build_dense_params(weight, bias, adj, n_spins, lane_dim):
    """(S,Co,Ci,K) weights + (Co,) bias -> ((lane_dim,lane_dim), (1,lane_dim))."""
    dense = _lattice_conv_dense_weight_np(weight, adj, n_spins)   # (CN, CN)
    cn = dense.shape[0]
    assert cn <= lane_dim
    w_full = np.zeros((lane_dim, lane_dim), dtype=np.float32)
    w_full[:cn, :cn] = dense
    b_full = np.zeros((1, lane_dim), dtype=np.float32)
    b_full[0, :cn] = np.repeat(np.asarray(bias, np.float32), n_spins)
    return w_full, b_full


# ----------------------------------------------------------------------------
# Pallas kernel: L stacked residual blocks for one (bt, lane_dim) batch tile.
# Weights/biases are VMEM-resident (constant index_map); activations pipeline.
# The zero-pad of the (bt, CN) input to (bt, lane_dim) happens in VMEM.
# ----------------------------------------------------------------------------
def _make_kagome_kernel(cn, num_layers):
    def kernel(x_ref, w1_ref, b1_ref, w2_ref, b2_ref, o_ref, xp_ref):
        # Lane-dense padded activations built in VMEM (no HBM-side padding).
        xp_ref[...] = jnp.zeros_like(xp_ref)
        xp_ref[:, :cn] = x_ref[...]
        xp = xp_ref[...]                                    # (bt, lane_dim)
        for l in range(num_layers):                         # static unroll
            # conv1 + bias + ReLU   (single-pass MXU, f32 accumulate)
            h = jnp.maximum(
                jnp.dot(xp, w1_ref[l], preferred_element_type=jnp.float32)
                + b1_ref[l], 0.0)
            # conv2 + bias
            y = (jnp.dot(h, w2_ref[l], preferred_element_type=jnp.float32)
                 + b2_ref[l])
            # residual + ReLU (padded lanes stay exactly 0 through the stack)
            xp = jnp.maximum(y + xp, 0.0)
        o_ref[...] = xp.astype(o_ref.dtype)
    return kernel


def kagome_residual_stack(x_ncl, w1, b1, w2, b2, *, b_tile=512,
                          return_padded=False):
    """Apply L fused KagomeResidualBlocks.

    x_ncl: (B, C, N) float32.
    w1, w2: (L, lane_dim, lane_dim) padded dense scattered weights.
    b1, b2: (L, 1, lane_dim) padded bias vectors.
    """
    B, C, N = x_ncl.shape
    cn = C * N
    L, lane_dim, _ = w1.shape
    assert lane_dim % LANE == 0 and cn <= lane_dim
    assert w2.shape == (L, lane_dim, lane_dim)
    assert b1.shape == (L, 1, lane_dim) and b2.shape == (L, 1, lane_dim)

    # Unpadded, lane-narrow input (block covers the full last dim -> legal).
    x_flat = x_ncl.reshape(B, cn).astype(jnp.float32)

    # Pad batch only to a multiple of 8 sublanes (<= 7 wasted rows).
    b_pad = _round_up(B, 8)
    if b_pad != B:
        x_flat = jnp.pad(x_flat, ((0, b_pad - B), (0, 0)))

    # Largest tile (multiple of 8, <= b_tile) that divides the padded batch.
    cap = max(8, min(_round_up(b_tile, 8), b_pad))
    bt = 8
    for cand in range(cap, 7, -8):
        if b_pad % cand == 0:
            bt = cand
            break
    grid = (b_pad // bt,)

    out_pad = pl.pallas_call(
        _make_kagome_kernel(cn, L),
        out_shape=jax.ShapeDtypeStruct((b_pad, lane_dim), jnp.float32),
        grid=grid,
        in_specs=[
            pl.BlockSpec((bt, cn), lambda i: (i, 0)),                   # x: tiled over B
            pl.BlockSpec((L, lane_dim, lane_dim), lambda i: (0, 0, 0)),  # w1 stack: resident
            pl.BlockSpec((L, 1, lane_dim), lambda i: (0, 0, 0)),         # b1 stack: resident
            pl.BlockSpec((L, lane_dim, lane_dim), lambda i: (0, 0, 0)),  # w2 stack: resident
            pl.BlockSpec((L, 1, lane_dim), lambda i: (0, 0, 0)),         # b2 stack: resident
        ],
        out_specs=pl.BlockSpec((bt, lane_dim), lambda i: (i, 0)),        # lane-dense stores
        scratch_shapes=[pltpu.VMEM((bt, lane_dim), jnp.float32)],        # in-VMEM padding buf
        compiler_params=pltpu.CompilerParams(
            dimension_semantics=("parallel",)),       # v7x: 2 TCs split the batch
    )(x_flat, w1, b1, w2, b2)

    if return_padded:
        return out_pad          # keep padded slab when chaining more kernels
    return out_pad[:B, :cn].reshape(B, C, N)


# ----------------------------------------------------------------------------
# Pure-JAX reference (direct gather semantics), for verification only.
# ----------------------------------------------------------------------------
def lattice_conv_ref(x, weight, bias, adj):
    outs = []
    for (s, neigh) in adj:
        xg = x[:, :, np.asarray(neigh)]                       # (B, C_in, K)
        yi = jnp.einsum("bck,ock->bo", xg, weight[s],
                        precision=jax.lax.Precision.HIGHEST) + bias
        outs.append(yi)
    return jnp.stack(outs, axis=2)                            # (B, C_out, N)


def kagome_block_ref(x, w1, b1, w2, b2, adj):
    h = jax.nn.relu(lattice_conv_ref(x, w1, b1, adj))
    y = lattice_conv_ref(h, w2, b2, adj)
    return jax.nn.relu(y + x)


# ----------------------------------------------------------------------------
if __name__ == "__main__":
    B, C, N, K, S = 32, 4, NUMBER_SPINS, KERNEL_SIZE, SUBLATTICES
    cn = C * N
    lane_dim = _round_up(cn, LANE)                            # 48 -> 128

    key = jax.random.PRNGKey(0)
    k1, k2, k3, k4, k5, k6, k7, k8, kx = jax.random.split(key, 9)

    # Deterministic synthetic parameters (LatticeConvolution shapes:
    # weight (sublattices, out_channels, in_channels, kernel_size), bias (out,))
    bound = 1.0 / np.sqrt(C * K)
    w1 = jax.random.uniform(k1, (S, C, C, K), jnp.float32, -bound, bound)
    b1 = jax.random.uniform(k2, (C,), jnp.float32, -bound, bound)
    w2 = jax.random.uniform(k3, (S, C, C, K), jnp.float32, -bound, bound)
    b2 = jax.random.uniform(k4, (C,), jnp.float32, -bound, bound)

    x = jax.random.normal(kx, (B, C, N), jnp.float32)         # NCL input

    # Dense scattered weights + explicit bias vectors, padded lane-dense.
    w1d, b1d = build_dense_params(w1, b1, KAGOME_12_ADJ, N, lane_dim)
    w2d, b2d = build_dense_params(w2, b2, KAGOME_12_ADJ, N, lane_dim)

    # ----- single block (matches the PyTorch module) -----
    w1_stack = jnp.asarray(w1d)[None]
    b1_stack = jnp.asarray(b1d)[None]
    w2_stack = jnp.asarray(w2d)[None]
    b2_stack = jnp.asarray(b2d)[None]

    out = kagome_residual_stack(x, w1_stack, b1_stack, w2_stack, b2_stack,
                                b_tile=512)
    out = jax.block_until_ready(out)

    # Reference is HIGHEST precision; kernel uses default (single-pass) MXU
    # precision, so allow a slightly looser tolerance.
    ref = kagome_block_ref(x, w1, b1, w2, b2, KAGOME_12_ADJ)
    np.testing.assert_allclose(np.asarray(out), np.asarray(ref),
                               rtol=2e-2, atol=2e-2)

    # ----- fused stack of 2 blocks in ONE pallas_call (structural win) -----
    w1b = jax.random.uniform(k5, (S, C, C, K), jnp.float32, -bound, bound)
    b1b = jax.random.uniform(k6, (C,), jnp.float32, -bound, bound)
    w2b = jax.random.uniform(k7, (S, C, C, K), jnp.float32, -bound, bound)
    b2b = jax.random.uniform(k8, (C,), jnp.float32, -bound, bound)
    w1bd, b1bd = build_dense_params(w1b, b1b, KAGOME_12_ADJ, N, lane_dim)
    w2bd, b2bd = build_dense_params(w2b, b2b, KAGOME_12_ADJ, N, lane_dim)

    w1_s2 = jnp.stack([jnp.asarray(w1d), jnp.asarray(w1bd)])
    b1_s2 = jnp.stack([jnp.asarray(b1d), jnp.asarray(b1bd)])
    w2_s2 = jnp.stack([jnp.asarray(w2d), jnp.asarray(w2bd)])
    b2_s2 = jnp.stack([jnp.asarray(b2d), jnp.asarray(b2bd)])

    out2 = jax.block_until_ready(
        kagome_residual_stack(x, w1_s2, b1_s2, w2_s2, b2_s2, b_tile=512))
    ref2 = kagome_block_ref(ref, w1b, b1b, w2b, b2b, KAGOME_12_ADJ)
    np.testing.assert_allclose(np.asarray(out2), np.asarray(ref2),
                               rtol=2e-2, atol=2e-2)

    print("KERNEL_OK")
</pallas_src>

<mosaic_0001>
module attributes {stable_mosaic.version = 11 : i64} {
  func.func @kernel(%arg0: i32, %arg1: memref<32x48xf32, #tpu.memory_space<vmem>>, %arg2: memref<1x128x128xf32, #tpu.memory_space<vmem>>, %arg3: memref<1x1x128xf32, #tpu.memory_space<vmem>>, %arg4: memref<1x128x128xf32, #tpu.memory_space<vmem>>, %arg5: memref<1x1x128xf32, #tpu.memory_space<vmem>>, %arg6: memref<32x128xf32, #tpu.memory_space<vmem>>, %arg7: memref<32x128xf32, #tpu.memory_space<vmem>>) attributes {dimension_semantics = [#tpu.dimension_semantics<parallel>], iteration_bounds = array<i64: 1>, scalar_prefetch = 0 : i64, scratch_operands = 1 : i64, tpu.core_type = #tpu.core_type<tc>, window_params = [{transform_indices = @transform_0, window_bounds = array<i64: 32, 48>}, {pipeline_mode = #tpu.pipeline_mode<synchronous>, transform_indices = @transform_1, window_bounds = array<i64: 1, 128, 128>}, {pipeline_mode = #tpu.pipeline_mode<synchronous>, transform_indices = @transform_2, window_bounds = array<i64: 1, 1, 128>}, {pipeline_mode = #tpu.pipeline_mode<synchronous>, transform_indices = @transform_3, window_bounds = array<i64: 1, 128, 128>}, {pipeline_mode = #tpu.pipeline_mode<synchronous>, transform_indices = @transform_4, window_bounds = array<i64: 1, 1, 128>}, {transform_indices = @transform_5, window_bounds = array<i64: 32, 128>}]} {
    %cst = arith.constant 0.000000e+00 : f32
    %0 = vector.broadcast %cst : f32 to vector<32x128xf32>
    %c0 = arith.constant 0 : index
    %c0_0 = arith.constant 0 : index
    %1 = vector.load %arg7[%c0, %c0_0] : memref<32x128xf32, #tpu.memory_space<vmem>>, vector<32x128xf32>
    tpu.vector_store %arg7[%c0, %c0_0], %0 {strides = array<i32>} : memref<32x128xf32, #tpu.memory_space<vmem>>, vector<32x128xf32>,
    %c0_1 = arith.constant 0 : index
    %c0_2 = arith.constant 0 : index
    %2 = vector.load %arg1[%c0_1, %c0_2] : memref<32x48xf32, #tpu.memory_space<vmem>>, vector<32x48xf32>
    %c0_3 = arith.constant 0 : index
    %c0_4 = arith.constant 0 : index
    %3 = vector.load %arg7[%c0_3, %c0_4] : memref<32x128xf32, #tpu.memory_space<vmem>>, vector<32x48xf32>
    tpu.vector_store %arg7[%c0_3, %c0_4], %2 {strides = array<i32>} : memref<32x128xf32, #tpu.memory_space<vmem>>, vector<32x48xf32>,
    %c0_5 = arith.constant 0 : index
    %c0_6 = arith.constant 0 : index
    %4 = vector.load %arg7[%c0_5, %c0_6] : memref<32x128xf32, #tpu.memory_space<vmem>>, vector<32x128xf32>
    %c0_7 = arith.constant 0 : index
    %c0_8 = arith.constant 0 : index
    %c0_9 = arith.constant 0 : index
    %5 = vector.load %arg2[%c0_7, %c0_8, %c0_9] : memref<1x128x128xf32, #tpu.memory_space<vmem>>, vector<1x128x128xf32>
    %6 = vector.shape_cast %5 : vector<1x128x128xf32> to vector<128x128xf32>
    %cst_10 = arith.constant dense<0.000000e+00> : vector<32x128xf32>
    %7 = tpu.matmul %4, %6, %cst_10 {dimension_numbers = #tpu.dot_dimension_numbers<[1], [0], [0], [1], [0, 0, 1, 1], [], []>} : vector<32x128xf32>, vector<128x128xf32>, vector<32x128xf32> -> vector<32x128xf32>
    %c0_11 = arith.constant 0 : index
    %c0_12 = arith.constant 0 : index
    %c0_13 = arith.constant 0 : index
    %8 = vector.load %arg3[%c0_11, %c0_12, %c0_13] : memref<1x1x128xf32, #tpu.memory_space<vmem>>, vector<1x1x128xf32>
    %9 = vector.shape_cast %8 : vector<1x1x128xf32> to vector<1x128xf32>
    %10 = vector.broadcast %9 : vector<1x128xf32> to vector<32x128xf32>
    %11 = arith.addf %7, %10 : vector<32x128xf32>
    %cst_14 = arith.constant 0.000000e+00 : f32
    %12 = vector.broadcast %cst_14 : f32 to vector<32x128xf32>
    %13 = arith.maximumf %11, %12 : vector<32x128xf32>
    %c0_15 = arith.constant 0 : index
    %c0_16 = arith.constant 0 : index
    %c0_17 = arith.constant 0 : index
    %14 = vector.load %arg4[%c0_15, %c0_16, %c0_17] : memref<1x128x128xf32, #tpu.memory_space<vmem>>, vector<1x128x128xf32>
    %15 = vector.shape_cast %14 : vector<1x128x128xf32> to vector<128x128xf32>
    %cst_18 = arith.constant dense<0.000000e+00> : vector<32x128xf32>
    %16 = tpu.matmul %13, %15, %cst_18 {dimension_numbers = #tpu.dot_dimension_numbers<[1], [0], [0], [1], [0, 0, 1, 1], [], []>} : vector<32x128xf32>, vector<128x128xf32>, vector<32x128xf32> -> vector<32x128xf32>
    %c0_19 = arith.constant 0 : index
    %c0_20 = arith.constant 0 : index
    %c0_21 = arith.constant 0 : index
    %17 = vector.load %arg5[%c0_19, %c0_20, %c0_21] : memref<1x1x128xf32, #tpu.memory_space<vmem>>, vector<1x1x128xf32>
    %18 = vector.shape_cast %17 : vector<1x1x128xf32> to vector<1x128xf32>
    %19 = vector.broadcast %18 : vector<1x128xf32> to vector<32x128xf32>
    %20 = arith.addf %16, %19 : vector<32x128xf32>
    %21 = arith.addf %20, %4 : vector<32x128xf32>
    %cst_22 = arith.constant 0.000000e+00 : f32
    %22 = vector.broadcast %cst_22 : f32 to vector<32x128xf32>
    %23 = arith.maximumf %21, %22 : vector<32x128xf32>
    %c0_23 = arith.constant 0 : index
    %c0_24 = arith.constant 0 : index
    %24 = vector.load %arg6[%c0_23, %c0_24] : memref<32x128xf32, #tpu.memory_space<vmem>>, vector<32x128xf32>
    tpu.vector_store %arg6[%c0_23, %c0_24], %23 {strides = array<i32>} : memref<32x128xf32, #tpu.memory_space<vmem>>, vector<32x128xf32>,
    return
  }
  func.func @transform_0(%arg0: i32) -> (i32, i32) {
    %c0_i32 = arith.constant 0 : i32
    %c0_i32_0 = arith.constant 0 : i32
    return %arg0, %c0_i32 : i32, i32
  }
  func.func @transform_1(%arg0: i32) -> (i32, i32, i32) {
    %c0_i32 = arith.constant 0 : i32
    %c0_i32_0 = arith.constant 0 : i32
    %c0_i32_1 = arith.constant 0 : i32
    %c0_i32_2 = arith.constant 0 : i32
    return %c0_i32, %c0_i32_0, %c0_i32_1 : i32, i32, i32
  }
  func.func @transform_2(%arg0: i32) -> (i32, i32, i32) {
    %c0_i32 = arith.constant 0 : i32
    %c0_i32_0 = arith.constant 0 : i32
    %c0_i32_1 = arith.constant 0 : i32
    %c0_i32_2 = arith.constant 0 : i32
    return %c0_i32, %c0_i32_0, %c0_i32_1 : i32, i32, i32
  }
  func.func @transform_3(%arg0: i32) -> (i32, i32, i32) {
    %c0_i32 = arith.constant 0 : i32
    %c0_i32_0 = arith.constant 0 : i32
    %c0_i32_1 = arith.constant 0 : i32
    %c0_i32_2 = arith.constant 0 : i32
    return %c0_i32, %c0_i32_0, %c0_i32_1 : i32, i32, i32
  }
  func.func @transform_4(%arg0: i32) -> (i32, i32, i32) {
    %c0_i32 = arith.constant 0 : i32
    %c0_i32_0 = arith.constant 0 : i32
    %c0_i32_1 = arith.constant 0 : i32
    %c0_i32_2 = arith.constant 0 : i32
    return %c0_i32, %c0_i32_0, %c0_i32_1 : i32, i32, i32
  }
  func.func @transform_5(%arg0: i32) -> (i32, i32) {
    %c0_i32 = arith.constant 0 : i32
    %c0_i32_0 = arith.constant 0 : i32
    return %arg0, %c0_i32 : i32, i32
  }
}

</mosaic_0001>

<bundles_post_ra>
// kernel: tpu_custom_call.1
= control target key start
LH: loop header
LB: loop body
LE: loop exit
PB: predicated region body
PF: predicated region fallthrough
CT: control target
= control target key end

     0   :  { %10 = vsyncpa [#allocation4], 0  ;;  %s726_s0 = inlined_call_operand.hbm [shape: f32[32,48], index: 0, kind: input, shape index: {}]   ;;  %s727_s1 = inlined_call_operand.hbm [shape: f32[1,128,128], index: 1, kind: input, shape index: {}]   ;;  %s728_s2 = inlined_call_operand.vmem [shape: f32[1,1,128], index: 2, kind: input, shape index: {}]   ;;  %s729_s3 = inlined_call_operand.hbm [shape: f32[1,128,128], index: 3, kind: input, shape index: {}]   ;;  %s730_s4 = inlined_call_operand.vmem [shape: f32[1,1,128], index: 4, kind: input, shape index: {}]   ;;  %s731_s5 = inlined_call_operand.hbm [shape: f32[32,128], index: 5, kind: output, shape index: {}]  }
   0x1   :  { %11 = vsyncpa [#allocation7], 0 }
   0x2   :  { %12 = vsyncpa [#allocation5], 0  ;;  %s612_s18 = smov [#allocation6]   ;;  %s613_s20 = smov [#allocation3]  }
   0x3   :  { %s30_s19 = sshll.u32 %s612_s18, 4  ;;  %s18_s21 = sshll.u32 %s613_s20, 4  ;;  %s31_s19 = int_to_ptr.vmem [resolvable:$true] %s30_s19  ;;  %s649_s21 = int_to_ptr.vmem [resolvable:$true] %s18_s21 }
   0x4   :  { %s518_s24 = scalar_lea.hbm %s727_s1, 2048 }
   0x5   :  { %p519_p0 = scmp.ne.s32.totalorder %s727_s1, %s518_s24  ;;  %p522_p1 = scmp.lt.u32.totalorder %s518_s24, %s727_s1 }
   0x7   :  { %p524_p2 = pnand %p522_p1, %p519_p0 }
   0x9   :  { %527 = shalt.err (!%p524_p2)
}
   0xa   :  { %s528_s29 = scalar_lea.vmem %s31_s19, 2048  ;;  %p533_p4 = scmp.lt.s32.totalorder %s31_s19, %s31_s19 }
   0xb   :  { %p529_p3 = scmp.ne.s32.totalorder %s31_s19, %s528_s29  ;;  %p534_p5 = scmp.lt.s32.totalorder %s528_s29, %s528_s29 }
   0xd   :  { %p535_p6 = por %p534_p5, %p533_p4 }
   0xf   :  { %p536_p7 = pnand %p535_p6, %p529_p3 }
  0x11   :  { %539 = shalt.err (!%p536_p7)
}
  0x12   :  { %s614_s30 = smov 128   ;;  %s615_s6 = smov 8  }
  0x13   :  { %36 = dma.hbm_to_vmem [thread:$0]  %s727_s1, 2048, %s31_s19, [#allocation7], %s614_s30, %s614_s30, %s615_s6  }
  0x14   :  { %s540_s11 = scalar_lea.hbm %s726_s0, 512 }
  0x15   :  { %p541_p8 = scmp.ne.s32.totalorder %s726_s0, %s540_s11  ;;  %p544_p9 = scmp.lt.u32.totalorder %s540_s11, %s726_s0 }
  0x17   :  { %p546_p10 = pnand %p544_p9, %p541_p8 }
  0x19   :  { %549 = shalt.err (!%p546_p10)
}
  0x1a   :  { %s550_s16 = scalar_lea.vmem %s649_s21, 512  ;;  %p555_p12 = scmp.lt.s32.totalorder %s649_s21, %s649_s21 }
  0x1b   :  { %p551_p11 = scmp.ne.s32.totalorder %s649_s21, %s550_s16  ;;  %p556_p13 = scmp.lt.s32.totalorder %s550_s16, %s550_s16 }
  0x1d   :  { %p557_p0 = por %p556_p13, %p555_p12 }
  0x1f   :  { %p558_p1 = pnand %p557_p0, %p551_p11 }
  0x21   :  { %561 = shalt.err (!%p558_p1)
}
  0x22   :  { %24 = dma.hbm_to_vmem [thread:$0]  %s726_s0, 512, %s649_s21, [#allocation4], %s614_s30, %s614_s30, %s615_s6  }
  0x23   :  { %s616_s18 = smov [#allocation8]   ;;  %s562_s23 = scalar_lea.hbm %s729_s3, 2048 }
  0x24   :  { %s44_s19 = sshll.u32 %s616_s18, 4  ;;  %p563_p2 = scmp.ne.s32.totalorder %s729_s3, %s562_s23  ;;  %s45_s19 = int_to_ptr.vmem [resolvable:$true] %s44_s19 }
  0x25   :  { %p566_p3 = scmp.lt.u32.totalorder %s562_s23, %s729_s3 }
  0x27   :  { %p568_p4 = pnand %p566_p3, %p563_p2 }
  0x29   :  { %571 = shalt.err (!%p568_p4)
}
  0x2a   :  { %s572_s28 = scalar_lea.vmem %s45_s19, 2048  ;;  %p577_p6 = scmp.lt.s32.totalorder %s45_s19, %s45_s19 }
  0x2b   :  { %p573_p5 = scmp.ne.s32.totalorder %s45_s19, %s572_s28  ;;  %p578_p7 = scmp.lt.s32.totalorder %s572_s28, %s572_s28 }
  0x2d   :  { %p579_p8 = por %p578_p7, %p577_p6 }
  0x2f   :  { %p580_p9 = pnand %p579_p8, %p573_p5 }
  0x31   :  { %583 = shalt.err (!%p580_p9)
}
  0x32   :  { %50 = dma.hbm_to_vmem [thread:$0]  %s729_s3, 2048, %s45_s19, [#allocation7], %s614_s30, %s614_s30, %s615_s6  }
  0x33   :  { %606 = dma.done.wait [#allocation4], 512  }
  0x34   :  { %607 = vsyncadd [#allocation4], 4294966784 }
  0x35   :  { %608 = dma.done.wait [#allocation7], 4096  }
  0x36   :  { %609 = vsyncadd [#allocation7], 4294963200  ;;  %v617_v0 = vmov 0.0   ;;  %v79_v1 = vld [vmem:[#allocation6] sm:$0xff]  ;;  %v80_v2 = vld [vmem:[#allocation6 + $0x8] sm:$0xff]  ;;  %vm70_vm0 = vcmask 392192  }
  0x37   :  { %62 = vst [vmem:[#allocation2] sm:$0xff] %v617_v0  ;;  %63 = vst [vmem:[#allocation2 + $0x8] sm:$0xff] %v617_v0  ;;  %v81_v3 = vld [vmem:[#allocation6 + $0x10] sm:$0xff]  ;;  %v447_v4 = vpack.c.bf16 %v80_v2, %v79_v1  ;;  %v82_v5 = vld [vmem:[#allocation6 + $0x18] sm:$0xff] }
  0x38   :  { %64 = vst [vmem:[#allocation2 + $0x10] sm:$0xff] %v617_v0  ;;  %65 = vst [vmem:[#allocation2 + $0x18] sm:$0xff] %v617_v0  ;;  %v451_v6 = vpack.c.bf16 %v82_v5, %v81_v3  ;;  %v83_v7 = vld [vmem:[#allocation6 + $0x20] sm:$0xff]  ;;  %v84_v8 = vld [vmem:[#allocation6 + $0x28] sm:$0xff] }
  0x39   :  { %448 = vmatprep.subr.bf16.mxu0 %v447_v4  ;;  %v85_v9 = vld [vmem:[#allocation6 + $0x30] sm:$0xff]  ;;  %v455_v10 = vpack.c.bf16 %v84_v8, %v83_v7  ;;  %v86_v11 = vld [vmem:[#allocation6 + $0x38] sm:$0xff]  ;;  %v66_v12 = vld [vmem:[#allocation3] sm:$0xff] }
  0x3a   :  { %450 = vmatpush3.bf16.msra.mxu0 %v447_v4  ;;  %v67_v13 = vld [vmem:[#allocation3 + $0x8] sm:$0xff]  ;;  %71 = vst.msk [vmem:[#allocation2] sm:$0xff] %vm70_vm0, %v66_v12  ;;  %v68_v14 = vld [vmem:[#allocation3 + $0x10] sm:$0xff]  ;;  %v69_v15 = vld [vmem:[#allocation3 + $0x18] sm:$0xff]  ;;  %v459_v22 = vpack.c.bf16 %v86_v11, %v85_v9 }
  0x3b   :  { %452 = vmatprep.subr.bf16.mxu0 %v451_v6  ;;  %72 = vst.msk [vmem:[#allocation2 + $0x8] sm:$0xff] %vm70_vm0, %v67_v13  ;;  %v191_v16 = vld [vmem:[#allocation8] sm:$0xff]  ;;  %73 = vst.msk [vmem:[#allocation2 + $0x10] sm:$0xff] %vm70_vm0, %v68_v14  ;;  %v192_v17 = vld [vmem:[#allocation8 + $0x8] sm:$0xff] }
  0x3c   :  { %74 = vst.msk [vmem:[#allocation2 + $0x18] sm:$0xff] %vm70_vm0, %v69_v15  ;;  %v193_v18 = vld [vmem:[#allocation8 + $0x10] sm:$0xff]  ;;  %v194_v19 = vld [vmem:[#allocation8 + $0x18] sm:$0xff]  ;;  %v479_v20 = vpack.c.bf16 %v192_v17, %v191_v16  ;;  %v195_v23 = vld [vmem:[#allocation8 + $0x20] sm:$0xff] }
  0x3d   :  { %v483_v21 = vpack.c.bf16 %v194_v19, %v193_v18  ;;  %v196_v24 = vld [vmem:[#allocation8 + $0x28] sm:$0xff]  ;;  %v87_v25 = vld [vmem:[#allocation6 + $0x40] sm:$0xff]  ;;  %v197_v30 = vld [vmem:[#allocation8 + $0x30] sm:$0xff] }
  0x3e   :  { %454 = vmatpush3.bf16.msra.mxu0 %v451_v6  ;;  %v88_v26 = vld [vmem:[#allocation6 + $0x48] sm:$0xff]  ;;  %480 = vmatprep.subr.bf16.mxu1 %v479_v20  ;;  %v487_v27 = vpack.c.bf16 %v196_v24, %v195_v23  ;;  %v198_v31 = vld [vmem:[#allocation8 + $0x38] sm:$0xff]  ;;  %v89_v32 = vld [vmem:[#allocation6 + $0x50] sm:$0xff] }
  0x3f   :  { %456 = vmatprep.subr.bf16.mxu0 %v455_v10  ;;  %482 = vmatpush3.bf16.msra.mxu1 %v479_v20  ;;  %v463_v28 = vpack.c.bf16 %v88_v26, %v87_v25  ;;  %v90_v33 = vld [vmem:[#allocation6 + $0x58] sm:$0xff]  ;;  %v491_v34 = vpack.c.bf16 %v198_v31, %v197_v30  ;;  %v199_v36 = vld [vmem:[#allocation8 + $0x40] sm:$0xff]  ;;  %v200_v37 = vld [vmem:[#allocation8 + $0x48] sm:$0xff] }
  0x40   :  { %484 = vmatprep.subr.bf16.mxu1 %v483_v21  ;;  %v467_v35 = vpack.c.bf16 %v90_v33, %v89_v32  ;;  %v91_v38 = vld [vmem:[#allocation6 + $0x60] sm:$0xff]  ;;  %v92_v39 = vld [vmem:[#allocation6 + $0x68] sm:$0xff]  ;;  %v495_v40 = vpack.c.bf16 %v200_v37, %v199_v36  ;;  %v201_v42 = vld [vmem:[#allocation8 + $0x50] sm:$0xff] }
  0x41   :  { %v701_v29 = vld [vmem:[#allocation2] sm:$0xff]  ;;  %v471_v41 = vpack.c.bf16 %v92_v39, %v91_v38  ;;  %v202_v43 = vld [vmem:[#allocation8 + $0x58] sm:$0xff]  ;;  %v93_v44 = vld [vmem:[#allocation6 + $0x70] sm:$0xff] }
  0x42   :  { %458 = vmatpush3.bf16.msra.mxu0 %v455_v10  ;;  %403 = vmatprep.mubr.f32.mxu0 %v701_v29  ;;  %v94_v45 = vld [vmem:[#allocation6 + $0x78] sm:$0xff]  ;;  %v499_v46 = vpack.c.bf16 %v202_v43, %v201_v42  ;;  %v203_v48 = vld [vmem:[#allocation8 + $0x60] sm:$0xff]  ;;  %v204_v49 = vld [vmem:[#allocation8 + $0x68] sm:$0xff] }
  0x43   :  { %460 = vmatprep.subr.bf16.mxu0 %v459_v22  ;;  %486 = vmatpush3.bf16.msra.mxu1 %v483_v21  ;;  %v475_v47 = vpack.c.bf16 %v94_v45, %v93_v44  ;;  %v503_v50 = vpack.c.bf16 %v204_v49, %v203_v48  ;;  %v76_v51 = vld [vmem:[#allocation2 + $0x8] sm:$0xff]  ;;  %v77_v52 = vld [vmem:[#allocation2 + $0x10] sm:$0xff]  ;;  %v78_v53 = vld [vmem:[#allocation2 + $0x18] sm:$0xff] }
  0x44   :  { %488 = vmatprep.subr.bf16.mxu1 %v487_v27  ;;  %v205_v54 = vld [vmem:[#allocation8 + $0x70] sm:$0xff]  ;;  %v206_v55 = vld [vmem:[#allocation8 + $0x78] sm:$0xff]  ;;  %v329_v57 = vld [vmem:[%s728_s2] ss:$0 sm:$0xff]  ;;  %s618_s2 = smov [#allocation9]  }
  0x45   :  { %v507_v56 = vpack.c.bf16 %v206_v55, %v205_v54  ;;  %v330_v6 = vld [vmem:[%s730_s4] ss:$0 sm:$0xff]  ;;  %s316_s9 = sshll.u32 %s618_s2, 4  ;;  %s317_s9 = int_to_ptr.vmem [resolvable:$true] %s316_s9 }
  0x46   :  { %462 = vmatpush3.bf16.msra.mxu0 %v459_v22  ;;  %s584_s4 = scalar_lea.vmem %s317_s9, 512  ;;  %p589_p11 = scmp.lt.s32.totalorder %s317_s9, %s317_s9 }
  0x47   :  { %464 = vmatprep.subr.bf16.mxu0 %v463_v28  ;;  %490 = vmatpush3.bf16.msra.mxu1 %v487_v27  ;;  %p585_p10 = scmp.ne.s32.totalorder %s317_s9, %s584_s4  ;;  %p590_p12 = scmp.lt.s32.totalorder %s584_s4, %s584_s4 }
  0x48   :  { %492 = vmatprep.subr.bf16.mxu1 %v491_v34 }
  0x49   :  { %p591_p13 = por %p590_p12, %p589_p11 }
  0x4a   :  { %466 = vmatpush3.bf16.msra.mxu0 %v463_v28 }
  0x4b   :  { %468 = vmatprep.subr.bf16.mxu0 %v467_v35  ;;  %494 = vmatpush3.bf16.msra.mxu1 %v491_v34  ;;  %p592_p0 = pnand %p591_p13, %p585_p10 }
  0x4c   :  { %496 = vmatprep.subr.bf16.mxu1 %v495_v40 }
  0x4e   :  { %470 = vmatpush3.bf16.msra.mxu0 %v467_v35 }
  0x4f   :  { %472 = vmatprep.subr.bf16.mxu0 %v471_v41  ;;  %498 = vmatpush3.bf16.msra.mxu1 %v495_v40 }
  0x50   :  { %500 = vmatprep.subr.bf16.mxu1 %v499_v46 }
  0x52   :  { %474 = vmatpush3.bf16.msra.mxu0 %v471_v41 }
  0x53   :  { %476 = vmatprep.subr.bf16.mxu0 %v475_v47  ;;  %502 = vmatpush3.bf16.msra.mxu1 %v499_v46 }
  0x54   :  { %504 = vmatprep.subr.bf16.mxu1 %v503_v50 }
  0x56   :  { %478 = vmatpush3.bf16.msra.mxu0 %v475_v47 }
  0x57   :  { %506 = vmatpush3.bf16.msra.mxu1 %v503_v50 }
  0x58   :  { %508 = vmatprep.subr.bf16.mxu1 %v507_v56 }
  0x59   :  { %404 = vmatmul.mubr.f32.vlgmr.msra.gmra.mrb[0].mxu0 %v76_v51 }
  0x5a   :  { %406 = vmatprep.mubr.f32.mxu0 %v77_v52 }
  0x5b   :  { %510 = vmatpush3.bf16.msra.mxu1 %v507_v56 }
  0x5d   :  { %407 = vmatmul.mubr.f32.gmra.mrb[2].mxu0 %v78_v53 }
 0x12c   :  { %v405_v58 = vpop.f32.mrb[0].mxu0 }
 0x12d   :  { %v174_v59 = vadd.f32 %v405_v58, %v329_v57  ;;  %v168_v60 = vpop.f32.mrb[1].mxu0 }
 0x12e   :  { %v169_v61 = vadd.f32 %v329_v57, %v168_v60 }
 0x12f   :  { %v188_v0 = vmax.f32 %v174_v59, 0.0 }
 0x130   :  { %v408_v62 = vpop.f32.mrb[2].mxu0  ;;  %v187_v63 = vmax.f32 %v169_v61, 0.0 }
 0x131   :  { %v184_v1 = vadd.f32 %v408_v62, %v329_v57  ;;  %v178_v2 = vpop.f32.mrb[3].mxu0 }
 0x132   :  { %v179_v3 = vadd.f32 %v329_v57, %v178_v2  ;;  %441 = vmatprep.mubr.f32.mxu1 %v187_v63 }
 0x133   :  { %442 = vmatmul.mubr.f32.vlgmr.msra.gmra.mrb[0].mxu1 %v188_v0  ;;  %v190_v5 = vmax.f32 %v184_v1, 0.0 }
 0x134   :  { %v189_v4 = vmax.f32 %v179_v3, 0.0 }
 0x136   :  { %444 = vmatprep.mubr.f32.mxu1 %v189_v4 }
 0x137   :  { %445 = vmatmul.mubr.f32.gmra.mrb[2].mxu1 %v190_v5 }
 0x206   :  { %v443_v7 = vpop.f32.mrb[0].mxu1 }
 0x207   :  { %v286_v8 = vadd.f32 %v443_v7, %v330_v6  ;;  %v280_v9 = vpop.f32.mrb[1].mxu1 }
 0x208   :  { %v281_v10 = vadd.f32 %v330_v6, %v280_v9 }
 0x209   :  { %v300_v11 = vadd.f32 %v286_v8, %v76_v51 }
 0x20a   :  { %v299_v12 = vadd.f32 %v281_v10, %v701_v29  ;;  %v446_v13 = vpop.f32.mrb[2].mxu1 }
 0x20b   :  { %v304_v14 = vmax.f32 %v300_v11, 0.0  ;;  %v296_v15 = vadd.f32 %v446_v13, %v330_v6  ;;  %v290_v16 = vpop.f32.mrb[3].mxu1 }
 0x20c   :  { %v303_v17 = vmax.f32 %v299_v12, 0.0  ;;  %v291_v18 = vadd.f32 %v330_v6, %v290_v16 }
 0x20d   :  { %308 = vst [vmem:[#allocation9 + $0x8] sm:$0xff] %v304_v14  ;;  %v302_v19 = vadd.f32 %v296_v15, %v78_v53 }
 0x20e   :  { %307 = vst [vmem:[#allocation9] sm:$0xff] %v303_v17  ;;  %v301_v20 = vadd.f32 %v291_v18, %v77_v52 }
 0x20f   :  { %v306_v21 = vmax.f32 %v302_v19, 0.0 }
 0x210   :  { %v305_v22 = vmax.f32 %v301_v20, 0.0 }
 0x211   :  { %310 = vst [vmem:[#allocation9 + $0x18] sm:$0xff] %v306_v21 }
 0x212   :  { %309 = vst [vmem:[#allocation9 + $0x10] sm:$0xff] %v305_v22 }
 0x213   :  { %595 = shalt.err (!%p592_p0)
}
 0x214   :  { %s596_s12 = scalar_lea.hbm %s731_s5, 512 }
 0x215   :  { %p597_p1 = scmp.ne.s32.totalorder %s731_s5, %s596_s12  ;;  %p600_p2 = scmp.lt.u32.totalorder %s596_s12, %s731_s5 }
 0x217   :  { %p602_p3 = pnand %p600_p2, %p597_p1 }
 0x219   :  { %605 = shalt.err (!%p602_p3)
}
 0x21a   :  { %322 = dma.vmem_to_hbm [thread:$0]  %s317_s9, 512, %s731_s5, [#allocation5], %s614_s30, %s614_s30, %s615_s6  }
 0x21b   :  { %610 = dma.done.wait [#allocation5], 512  }
 0x21c   :  { %611 = vsyncadd [#allocation5], 4294966784 }
 0x21d   :  { %326 = vsyncpa [#allocation4], 1 }
 0x21e   :  { %327 = vsyncpa [#allocation7], 1 }
 0x21f   :  { %328 = vsyncpa [#allocation5], 1 }

</bundles_post_ra>
